<compile_context>
chip_gen: v6e
topology: v6e:2x2x1
jax: 0.10.0
libtpu: 0.0.40
codegen_flags: <defaults>
</compile_context>

<pallas_src>
import math

import jax
import jax.numpy as jnp
from jax.experimental import pallas as pl
from jax.experimental.pallas import tpu as pltpu


# ------------------------------------------------------------------------------------
# Kernel: out_tile = img_tile @ A + txt_tile @ B + c
# ------------------------------------------------------------------------------------
def _fused_cross_attention_kernel(img_ref, txt_ref, a_ref, b_ref, c_ref, out_ref):
    out_ref[...] = (
        jnp.dot(img_ref[...], a_ref[...], preferred_element_type=jnp.float32)
        + jnp.dot(txt_ref[...], b_ref[...], preferred_element_type=jnp.float32)
        + c_ref[...]
    )


# ------------------------------------------------------------------------------------
# Offline weight folding (exact algebra; attention weights are identically 1 because
# the key sequence length is 1, so MHA(q, kv, kv) == kv @ Wv^T Wo^T + (bv Wo^T + bo)).
# ------------------------------------------------------------------------------------
def _fold_params(params):
    wo_t = params["wo"].T                       # [E, E]
    m = params["wv"].T @ wo_t                   # [E, E]   Wv^T Wo^T
    a = params["wi"].T @ m                      # [Di, E]
    b = params["wt"].T @ m                      # [Dt, E]
    c = (params["bi"] + params["bt"]) @ m + 2.0 * (params["bv"] @ wo_t + params["bo"])
    return a, b, c.reshape(1, -1)               # c: [1, E]


# ------------------------------------------------------------------------------------
# Wrapper: batch-tiled pallas_call.
# ------------------------------------------------------------------------------------
def cross_attention_pallas(image_features, text_features, params, num_heads):
    # num_heads only affects the (dead) per-head softmax, which is identically 1 here.
    del num_heads
    B, Di = image_features.shape
    Dt = text_features.shape[1]
    E = params["wi"].shape[0]

    a, b, c = _fold_params(params)

    # Row tiling: sublane-aligned batch tiles (big tiles when B is large, minimal pad
    # when B is tiny).  Weights stay resident (full-block) across the grid.
    if B >= 512:
        tile_b = 512
    else:
        tile_b = max(8, ((B + 7) // 8) * 8)
    padded_b = ((B + tile_b - 1) // tile_b) * tile_b
    if padded_b != B:
        pad = padded_b - B
        image_features = jnp.pad(image_features, ((0, pad), (0, 0)))
        text_features = jnp.pad(text_features, ((0, pad), (0, 0)))

    grid = (padded_b // tile_b,)

    out = pl.pallas_call(
        _fused_cross_attention_kernel,
        out_shape=jax.ShapeDtypeStruct((padded_b, E), jnp.float32),
        grid_spec=pltpu.PrefetchScalarGridSpec(
            num_scalar_prefetch=0,
            grid=grid,
            in_specs=[
                pl.BlockSpec((tile_b, Di), lambda i: (i, 0)),   # image rows
                pl.BlockSpec((tile_b, Dt), lambda i: (i, 0)),   # text rows
                pl.BlockSpec((Di, E), lambda i: (0, 0)),        # fused weight A (resident)
                pl.BlockSpec((Dt, E), lambda i: (0, 0)),        # fused weight B (resident)
                pl.BlockSpec((1, E), lambda i: (0, 0)),         # fused bias c (resident)
            ],
            out_specs=pl.BlockSpec((tile_b, E), lambda i: (i, 0)),
        ),
        compiler_params=pltpu.CompilerParams(
            dimension_semantics=("parallel",),          # shards batch tiles across TCs (v7x)
            vmem_limit_bytes=32 * 1024 * 1024,          # explicit budget, safe on v5e/v6e/v7x
        ),
    )(image_features, text_features, a, b, c)

    return out[:B]


# ------------------------------------------------------------------------------------
# Plain-JAX reference mirroring PyTorch nn.MultiheadAttention semantics (seq len 1),
# with the full (un-folded) q/k/v/softmax path.
# ------------------------------------------------------------------------------------
def cross_attention_reference(image_features, text_features, params, num_heads):
    E = params["wi"].shape[0]
    D = E // num_heads
    B = image_features.shape[0]

    img_p = image_features @ params["wi"].T + params["bi"]
    txt_p = text_features @ params["wt"].T + params["bt"]

    def mha(q_in, kv_in):
        q = q_in @ params["wq"].T + params["bq"]
        k = kv_in @ params["wk"].T + params["bk"]
        v = kv_in @ params["wv"].T + params["bv"]
        qh = q.reshape(B, num_heads, D)
        kh = k.reshape(B, num_heads, D)
        vh = v.reshape(B, num_heads, D)
        scores = jnp.sum(qh * kh, axis=-1, keepdims=True) / math.sqrt(D)   # [B, H, 1]
        w = jax.nn.softmax(scores, axis=-1)                                # single key -> 1
        attn = (w * vh).reshape(B, E)
        return attn @ params["wo"].T + params["bo"]

    return mha(img_p, txt_p) + mha(txt_p, img_p)


def init_params(key, image_embed_dim, text_embed_dim, common_embed_dim):
    E = common_embed_dim
    keys = jax.random.split(key, 12)

    def lin(k, out_dim, in_dim):
        bound = 1.0 / math.sqrt(in_dim)
        return jax.random.uniform(k, (out_dim, in_dim), jnp.float32, -bound, bound)

    return {
        "wi": lin(keys[0], E, image_embed_dim),
        "bi": jax.random.uniform(keys[1], (E,), jnp.float32, -0.1, 0.1),
        "wt": lin(keys[2], E, text_embed_dim),
        "bt": jax.random.uniform(keys[3], (E,), jnp.float32, -0.1, 0.1),
        # nn.MultiheadAttention in_proj split into q/k/v rows
        "wq": lin(keys[4], E, E),
        "wk": lin(keys[5], E, E),
        "wv": lin(keys[6], E, E),
        "bq": jax.random.uniform(keys[7], (E,), jnp.float32, -0.1, 0.1),
        "bk": jax.random.uniform(keys[8], (E,), jnp.float32, -0.1, 0.1),
        "bv": jax.random.uniform(keys[9], (E,), jnp.float32, -0.1, 0.1),
        "wo": lin(keys[10], E, E),
        "bo": jax.random.uniform(keys[11], (E,), jnp.float32, -0.1, 0.1),
    }


if __name__ == "__main__":
    B = 2
    image_embed_dim = 48
    text_embed_dim = 40
    common_embed_dim = 32
    num_heads = 4

    key = jax.random.PRNGKey(0)
    k_img, k_txt, k_par = jax.random.split(key, 3)
    image_features = jax.random.normal(k_img, (B, image_embed_dim), jnp.float32)
    text_features = jax.random.normal(k_txt, (B, text_embed_dim), jnp.float32)
    params = init_params(k_par, image_embed_dim, text_embed_dim, common_embed_dim)

    out = cross_attention_pallas(image_features, text_features, params, num_heads)
    out = jax.block_until_ready(out)

    ref = cross_attention_reference(image_features, text_features, params, num_heads)
    assert out.shape == (B, common_embed_dim)
    assert jnp.allclose(out, ref, atol=2e-5, rtol=1e-5), "Pallas kernel mismatch vs reference"

    # TODO(synk): for bandwidth-bound large-B deployments, cast the fused weights and
    # activations to bf16 (v6e/v7x MXU-native) and pad E to a multiple of 128 for
    # lane-dense output stores; kept f32 / native E here for bit-accurate small-shape checks.
    print("KERNEL_OK")
</pallas_src>

<mosaic_0001>
module attributes {stable_mosaic.version = 11 : i64} {
  func.func @_fused_cross_attention_kernel(%arg0: i32, %arg1: memref<8x48xf32, #tpu.memory_space<vmem>>, %arg2: memref<8x40xf32, #tpu.memory_space<vmem>>, %arg3: memref<48x32xf32, #tpu.memory_space<vmem>>, %arg4: memref<40x32xf32, #tpu.memory_space<vmem>>, %arg5: memref<1x32xf32, #tpu.memory_space<vmem>>, %arg6: memref<8x32xf32, #tpu.memory_space<vmem>>) attributes {dimension_semantics = [#tpu.dimension_semantics<parallel>], iteration_bounds = array<i64: 1>, scalar_prefetch = 0 : i64, scratch_operands = 0 : i64, tpu.core_type = #tpu.core_type<tc>, window_params = [{transform_indices = @transform_0, window_bounds = array<i64: 8, 48>}, {transform_indices = @transform_1, window_bounds = array<i64: 8, 40>}, {pipeline_mode = #tpu.pipeline_mode<synchronous>, transform_indices = @transform_2, window_bounds = array<i64: 48, 32>}, {pipeline_mode = #tpu.pipeline_mode<synchronous>, transform_indices = @transform_3, window_bounds = array<i64: 40, 32>}, {pipeline_mode = #tpu.pipeline_mode<synchronous>, transform_indices = @transform_4, window_bounds = array<i64: 1, 32>}, {transform_indices = @transform_5, window_bounds = array<i64: 8, 32>}]} {
    %c0 = arith.constant 0 : index
    %c0_0 = arith.constant 0 : index
    %0 = vector.load %arg1[%c0, %c0_0] : memref<8x48xf32, #tpu.memory_space<vmem>>, vector<8x48xf32>
    %c0_1 = arith.constant 0 : index
    %c0_2 = arith.constant 0 : index
    %1 = vector.load %arg3[%c0_1, %c0_2] : memref<48x32xf32, #tpu.memory_space<vmem>>, vector<48x32xf32>
    %cst = arith.constant dense<0.000000e+00> : vector<8x32xf32>
    %2 = tpu.matmul %0, %1, %cst {dimension_numbers = #tpu.dot_dimension_numbers<[1], [0], [0], [1], [0, 0, 1, 1], [], []>} : vector<8x48xf32>, vector<48x32xf32>, vector<8x32xf32> -> vector<8x32xf32>
    %c0_3 = arith.constant 0 : index
    %c0_4 = arith.constant 0 : index
    %3 = vector.load %arg2[%c0_3, %c0_4] : memref<8x40xf32, #tpu.memory_space<vmem>>, vector<8x40xf32>
    %c0_5 = arith.constant 0 : index
    %c0_6 = arith.constant 0 : index
    %4 = vector.load %arg4[%c0_5, %c0_6] : memref<40x32xf32, #tpu.memory_space<vmem>>, vector<40x32xf32>
    %cst_7 = arith.constant dense<0.000000e+00> : vector<8x32xf32>
    %5 = tpu.matmul %3, %4, %cst_7 {dimension_numbers = #tpu.dot_dimension_numbers<[1], [0], [0], [1], [0, 0, 1, 1], [], []>} : vector<8x40xf32>, vector<40x32xf32>, vector<8x32xf32> -> vector<8x32xf32>
    %6 = arith.addf %2, %5 : vector<8x32xf32>
    %c0_8 = arith.constant 0 : index
    %c0_9 = arith.constant 0 : index
    %7 = vector.load %arg5[%c0_8, %c0_9] : memref<1x32xf32, #tpu.memory_space<vmem>>, vector<1x32xf32>
    %8 = vector.broadcast %7 : vector<1x32xf32> to vector<8x32xf32>
    %9 = arith.addf %6, %8 : vector<8x32xf32>
    %c0_10 = arith.constant 0 : index
    %c0_11 = arith.constant 0 : index
    %10 = vector.load %arg6[%c0_10, %c0_11] : memref<8x32xf32, #tpu.memory_space<vmem>>, vector<8x32xf32>
    tpu.vector_store %arg6[%c0_10, %c0_11], %9 {strides = array<i32>} : memref<8x32xf32, #tpu.memory_space<vmem>>, vector<8x32xf32>,
    return
  }
  func.func @transform_0(%arg0: i32) -> (i32, i32) {
    %c0_i32 = arith.constant 0 : i32
    %c0_i32_0 = arith.constant 0 : i32
    return %arg0, %c0_i32 : i32, i32
  }
  func.func @transform_1(%arg0: i32) -> (i32, i32) {
    %c0_i32 = arith.constant 0 : i32
    %c0_i32_0 = arith.constant 0 : i32
    return %arg0, %c0_i32 : i32, i32
  }
  func.func @transform_2(%arg0: i32) -> (i32, i32) {
    %c0_i32 = arith.constant 0 : i32
    %c0_i32_0 = arith.constant 0 : i32
    %c0_i32_1 = arith.constant 0 : i32
    return %c0_i32, %c0_i32_0 : i32, i32
  }
  func.func @transform_3(%arg0: i32) -> (i32, i32) {
    %c0_i32 = arith.constant 0 : i32
    %c0_i32_0 = arith.constant 0 : i32
    %c0_i32_1 = arith.constant 0 : i32
    return %c0_i32, %c0_i32_0 : i32, i32
  }
  func.func @transform_4(%arg0: i32) -> (i32, i32) {
    %c0_i32 = arith.constant 0 : i32
    %c0_i32_0 = arith.constant 0 : i32
    %c0_i32_1 = arith.constant 0 : i32
    return %c0_i32, %c0_i32_0 : i32, i32
  }
  func.func @transform_5(%arg0: i32) -> (i32, i32) {
    %c0_i32 = arith.constant 0 : i32
    %c0_i32_0 = arith.constant 0 : i32
    return %arg0, %c0_i32 : i32, i32
  }
}

</mosaic_0001>

<bundles_post_ra>
// kernel: tpu_custom_call.1
= control target key start
LH: loop header
LB: loop body
LE: loop exit
PB: predicated region body
PF: predicated region fallthrough
CT: control target
= control target key end

     0   :  { %v275_v2 = vmov 0.0   ;;  %s353_s0 = inlined_call_operand.vmem [shape: f32[8,48], index: 0, kind: input, shape index: {}]   ;;  %s354_s1 = inlined_call_operand.vmem [shape: f32[8,40], index: 1, kind: input, shape index: {}]   ;;  %s355_s2 = inlined_call_operand.vmem [shape: f32[48,32], index: 2, kind: input, shape index: {}]   ;;  %s356_s3 = inlined_call_operand.vmem [shape: f32[40,32], index: 3, kind: input, shape index: {}]   ;;  %s357_s4 = inlined_call_operand.vmem [shape: f32[1,32], index: 4, kind: input, shape index: {}]   ;;  %s358_s5 = inlined_call_operand.hbm [shape: f32[8,32], index: 5, kind: output, shape index: {}]  }
   0x1   :  { %v33_v0 = vld [vmem:[%s356_s3 + $0x20] sm:$0xff]  ;;  %v27_v1 = vld [vmem:[%s355_s2 + $0x28] sm:$0xff]  ;;  %222 = vmatprep.subr.mxu0 %v275_v2  ;;  %235 = vmatprep.subr.mxu1 %v275_v2  ;;  %v32_v3 = vld [vmem:[%s356_s3 + $0x18] sm:$0xff] }
   0x2   :  { %v26_v4 = vld [vmem:[%s355_s2 + $0x20] sm:$0xff]  ;;  %223 = vmatpush3.msra.mxu0 %v33_v0  ;;  %236 = vmatpush3.msra.mxu1 %v27_v1  ;;  %v31_v5 = vld [vmem:[%s356_s3 + $0x10] sm:$0xff]  ;;  %v25_v6 = vld [vmem:[%s355_s2 + $0x18] sm:$0xff] }
   0x3   :  { %224 = vmatprep.subr.mxu0 %v275_v2  ;;  %237 = vmatprep.subr.mxu1 %v275_v2 }
   0x4   :  { %225 = vmatpush3.msra.mxu0 %v32_v3  ;;  %238 = vmatpush3.msra.mxu1 %v26_v4 }
   0x5   :  { %10 = vsyncpa [#allocation3], 0  ;;  %226 = vmatprep.subr.mxu0 %v275_v2  ;;  %239 = vmatprep.subr.mxu1 %v275_v2  ;;  %v30_v7 = vld [vmem:[%s356_s3 + $0x8] sm:$0xff]  ;;  %v24_v8 = vld [vmem:[%s355_s2 + $0x10] sm:$0xff]  ;;  %vm34_vm0 = vcmask 326656   ;;  %vm276_vm1 = vmmov 0  }
   0x6   :  { %227 = vmatpush3.msra.mxu0 %v31_v5  ;;  %240 = vmatpush3.msra.mxu1 %v25_v6  ;;  %v29_v9 = vld [vmem:[%s356_s3] sm:$0xff]  ;;  %v23_v10 = vld [vmem:[%s355_s2 + $0x8] sm:$0xff]  ;;  %vm108_vm2 = vcmask 392192   ;;  %s277_s19 = smov [#allocation2]   ;;  %vm190_vm3 = vcmask 261120  }
   0x7   :  { %228 = vmatprep.subr.mxu0 %v275_v2  ;;  %241 = vmatprep.subr.mxu1 %v275_v2  ;;  %v28_v11 = vld [vmem:[%s354_s1] sm:$0xff] }
   0x8   :  { %229 = vmatpush3.msra.mxu0 %v30_v7  ;;  %242 = vmatpush3.msra.mxu1 %v24_v8  ;;  %v22_v12 = vld [vmem:[%s355_s2] sm:$0xff]  ;;  %s198_s2 = sshll.u32 %s277_s19, 4  ;;  %s199_s2 = int_to_ptr.vmem [resolvable:$true] %s198_s2 }
   0x9   :  { %230 = vmatprep.subr.mxu0 %v275_v2  ;;  %243 = vmatprep.subr.mxu1 %v275_v2  ;;  %v21_v13 = vld [vmem:[%s353_s0] sm:$0xff]  ;;  %s253_s0 = scalar_lea.vmem %s199_s2, 128  ;;  %p258_p1 = scmp.lt.s32.totalorder %s199_s2, %s199_s2 }
   0xa   :  { %231 = vmatpush3.msra.mxu0 %v29_v9  ;;  %232 = vmatprep.mubr.msk.f32.mxu0 %vm276_vm1, %v275_v2  ;;  %v208_v17 = vld [vmem:[%s357_s4] ss:$0 sm:$0xff]  ;;  %p254_p0 = scmp.ne.s32.totalorder %s199_s2, %s253_s0  ;;  %p259_p2 = scmp.lt.s32.totalorder %s253_s0, %s253_s0 }
   0xb   :  { %244 = vmatpush3.msra.mxu1 %v23_v10  ;;  %233 = vmatmul.mubr.msk.f32.vlgmr.msra.gmra.mxu0 %vm34_vm0, %v28_v11 }
   0xc   :  { %245 = vmatprep.subr.mxu1 %v275_v2  ;;  %247 = vmatprep.mubr.msk.f32.mxu1 %vm276_vm1, %v275_v2  ;;  %p260_p3 = por %p259_p2, %p258_p1 }
   0xd   :  { %246 = vmatpush3.msra.mxu1 %v22_v12 }
   0xe   :  { %248 = vmatmul.mubr.msk.f32.vlgmr.msra.gmra.mxu1 %vm108_vm2, %v21_v13  ;;  %p261_p4 = pnand %p260_p3, %p254_p0 }
  0xcb   :  { %v104_v14 = vpop.f32.mrf.mxu0 }
  0xcd   :  { %v234_v15 = vpop.f32.mrf.mxu0 }
  0xce   :  { %v178_v16 = vpop.f32.mrf.mxu1 }
  0xcf   :  { %v179_v18 = vadd.f32 %v178_v16, %v104_v14 }
  0xd0   :  { %v249_v19 = vpop.f32.mrf.mxu1 }
  0xd1   :  { %v189_v20 = vadd.f32 %v208_v17, %v179_v18 }
  0xd3   :  { %191 = vst.msk [vmem:[#allocation2] sm:$0xff] %vm190_vm3, %v189_v20 }
  0xd4   :  { %264 = shalt.err (!%p261_p4)
}
  0xd5   :  { %201 = dma.vmem_to_hbm [thread:$0]  %s199_s2, 128, %s358_s5, [#allocation3]  }
  0xd6   :  { %273 = dma.done.wait [#allocation3], 128  }
  0xd7   :  { %274 = vsyncadd [#allocation3], 4294967168 }
  0xd8   :  { %205 = vsyncpa [#allocation3], 1 }

</bundles_post_ra>
